<compile_context>
chip_gen: v5e
topology: v5e:2x2
jax: 0.10.0
libtpu: 0.0.40
codegen_flags: <defaults>
</compile_context>

<pallas_src>
import math
from functools import partial

import jax
import jax.numpy as jnp
import numpy as np
from jax import lax
from jax.experimental import pallas as pl
from jax.experimental.pallas import tpu as pltpu  # noqa: F401  (TPU-specific tuning hooks)


# ----------------------------- kernel helpers -----------------------------

def _layer_norm(x, gamma, beta, eps):
    mean = jnp.mean(x, axis=-1, keepdims=True)
    var = jnp.mean(jnp.square(x - mean), axis=-1, keepdims=True)
    return (x - mean) * lax.rsqrt(var + eps) * gamma + beta


def _new_gelu(x):
    c = math.sqrt(2.0 / math.pi)
    return 0.5 * x * (1.0 + jnp.tanh(c * (x + 0.044715 * x * x * x)))


def make_block_kernel(B, T, n_head, eps):
    def kernel(x_ref,
               ln1_g, ln1_b,
               w_qkv, b_qkv,
               w_proj, b_proj,
               ln2_g, ln2_b, w_fc, b_fc, w_fc2, b_fc2,
               out_ref):
        x = x_ref[...]                      # (B*T, C) rows
        BT, C = x.shape
        hd = C // n_head
        scale = 1.0 / math.sqrt(hd)

        # ---- LN1 + fused QKV projection (one (C, 3C) MXU pass) ----
        xn = _layer_norm(x, ln1_g[...], ln1_b[...], eps)
        qkv = jnp.dot(xn, w_qkv[...], preferred_element_type=jnp.float32) + b_qkv[...]

        # present (k, v): written straight from the fused slab into the packed
        # output (lanes [C, 3C)), one DMA shared with y.
        out_ref[:, C:] = qkv[:, C:]

        qs = qkv[:, :C] * scale             # fold 1/sqrt(hd) into q once
        k = qkv[:, C:2 * C]
        v = qkv[:, 2 * C:]

        # ---- additive causal mask, built once per call (T, T) ----
        rows = lax.broadcasted_iota(jnp.int32, (T, T), 0)
        cols = lax.broadcasted_iota(jnp.int32, (T, T), 1)
        mask_add = jnp.where(cols <= rows, 0.0, -1e30).astype(jnp.float32)

        # ---- causal MHSA: heads statically unrolled (Mosaic cannot lower the
        # lane->sublane head transpose needed to batch over (B, n_head)), each
        # head batched over B; contexts gathered for a single w_proj matmul. ----
        ctx_heads = []
        for h in range(n_head):
            sl = slice(h * hd, (h + 1) * hd)
            qh = qs[:, sl].reshape(B, T, hd)
            kh = k[:, sl].reshape(B, T, hd)
            vh = v[:, sl].reshape(B, T, hd)
            att = jnp.einsum("bqd,bkd->bqk", qh, kh,
                             preferred_element_type=jnp.float32)
            att = att + mask_add            # (B,T,T) + (T,T) broadcast
            att = att - jnp.max(att, axis=-1, keepdims=True)
            p = jnp.exp(att)
            p = p * pl.reciprocal(jnp.sum(p, axis=-1, keepdims=True), approx=True)
            oh = jnp.einsum("bqk,bkd->bqd", p, vh,
                            preferred_element_type=jnp.float32)
            ctx_heads.append(oh.reshape(BT, hd))

        y = jnp.concatenate(ctx_heads, axis=-1)           # (BT, C)
        attn_out = jnp.dot(y, w_proj[...],
                           preferred_element_type=jnp.float32) + b_proj[...]
        x1 = x + attn_out

        # ---- LN2 + MLP (Linear -> new_gelu -> Linear) + residual ----
        # TODO(synk): EvolvableMLP assumed with layer_norm=False / identity output activation
        x2n = _layer_norm(x1, ln2_g[...], ln2_b[...], eps)
        hid = _new_gelu(jnp.dot(x2n, w_fc[...], preferred_element_type=jnp.float32)
                        + b_fc[...])
        mlp_out = jnp.dot(hid, w_fc2[...], preferred_element_type=jnp.float32) + b_fc2[...]

        out_ref[:, :C] = x1 + mlp_out

    return kernel


# ------------------------------- wrapper ----------------------------------

@partial(jax.jit, static_argnames=("n_head", "eps"))
def block_forward(x, params, n_head, eps=1e-5):
    """x: (B, T, C) float32. Returns (y, (present_k, present_v))."""
    B, T, C = x.shape
    hd = C // n_head
    x_flat = x.reshape(B * T, C)

    kernel = make_block_kernel(B, T, n_head, eps)
    # Single invocation, no grid: all activations + weights (a few KB) live in
    # VMEM at once; a grid would only add ~0.35us/step overhead at this size.
    ykv = pl.pallas_call(
        kernel,
        out_shape=jax.ShapeDtypeStruct((B * T, 3 * C), jnp.float32),
    )(x_flat,
      params["ln1_g"], params["ln1_b"],
      params["w_qkv"], params["b_qkv"],
      params["w_proj"], params["b_proj"],
      params["ln2_g"], params["ln2_b"],
      params["w_fc"], params["b_fc"],
      params["w_fc2"], params["b_fc2"])

    # Split the packed (BT, 3C) result; these stay inside the same jit as the
    # pallas_call so they fuse rather than becoming separate tiny HLO programs.
    y = ykv[:, :C].reshape(B, T, C)
    present_k = ykv[:, C:2 * C].reshape(B, T, n_head, hd).transpose(0, 2, 1, 3)
    present_v = ykv[:, 2 * C:].reshape(B, T, n_head, hd).transpose(0, 2, 1, 3)
    return y, (present_k, present_v)


# --------------------------- pure-JAX reference ----------------------------

def block_forward_ref(x, params, n_head, eps=1e-5):
    B, T, C = x.shape
    hd = C // n_head

    def ln(z, g, b):
        m = z.mean(-1, keepdims=True)
        v = ((z - m) ** 2).mean(-1, keepdims=True)
        return (z - m) / jnp.sqrt(v + eps) * g[0] + b[0]

    xn = ln(x, params["ln1_g"], params["ln1_b"])
    qkv = xn @ params["w_qkv"] + params["b_qkv"][0]
    q, k, v = jnp.split(qkv, 3, axis=-1)
    qh = q.reshape(B, T, n_head, hd).transpose(0, 2, 1, 3)
    kh = k.reshape(B, T, n_head, hd).transpose(0, 2, 1, 3)
    vh = v.reshape(B, T, n_head, hd).transpose(0, 2, 1, 3)
    att = jnp.einsum("bhqd,bhkd->bhqk", qh, kh) / math.sqrt(hd)
    mask = jnp.tril(jnp.ones((T, T), bool))
    att = jnp.where(mask, att, -1e30)
    att = jax.nn.softmax(att, axis=-1)
    y = jnp.einsum("bhqk,bhkd->bhqd", att, vh)
    y = y.transpose(0, 2, 1, 3).reshape(B, T, C)
    attn_out = y @ params["w_proj"] + params["b_proj"][0]
    x1 = x + attn_out
    x2n = ln(x1, params["ln2_g"], params["ln2_b"])
    c = math.sqrt(2.0 / math.pi)
    hdn = x2n @ params["w_fc"] + params["b_fc"][0]
    hdn = 0.5 * hdn * (1.0 + jnp.tanh(c * (hdn + 0.044715 * hdn ** 3)))
    mlp_out = hdn @ params["w_fc2"] + params["b_fc2"][0]
    return x1 + mlp_out, (kh, vh)


# --------------------------------- main ------------------------------------

if __name__ == "__main__":
    B, T, C = 2, 8, 32        # batch, seq (== block_size), n_embd
    n_head = 4
    hidden = 64               # MLP hidden_size

    key = jax.random.PRNGKey(0)
    ks = jax.random.split(key, 16)
    init = lambda k, shape, s=0.02: (s * jax.random.normal(k, shape)).astype(jnp.float32)

    params = {
        "ln1_g": jnp.ones((1, C), jnp.float32),
        "ln1_b": jnp.zeros((1, C), jnp.float32),
        "w_qkv": init(ks[0], (C, 3 * C)),
        "b_qkv": init(ks[1], (1, 3 * C)),
        "w_proj": init(ks[2], (C, C)),
        "b_proj": init(ks[3], (1, C)),
        "ln2_g": jnp.ones((1, C), jnp.float32),
        "ln2_b": jnp.zeros((1, C), jnp.float32),
        "w_fc": init(ks[4], (C, hidden)),
        "b_fc": init(ks[5], (1, hidden)),
        "w_fc2": init(ks[6], (hidden, C)),
        "b_fc2": init(ks[7], (1, C)),
    }

    x = jax.random.normal(ks[8], (B, T, C), jnp.float32)

    y, (pk, pv) = block_forward(x, params, n_head=n_head)
    jax.block_until_ready((y, pk, pv))

    y_ref, (pk_ref, pv_ref) = block_forward_ref(x, params, n_head)
    np.testing.assert_allclose(np.asarray(y), np.asarray(y_ref), rtol=5e-4, atol=5e-4)
    np.testing.assert_allclose(np.asarray(pk), np.asarray(pk_ref), rtol=5e-4, atol=5e-4)
    np.testing.assert_allclose(np.asarray(pv), np.asarray(pv_ref), rtol=5e-4, atol=5e-4)

    print("KERNEL_OK")
</pallas_src>

<mosaic_0001>
module attributes {stable_mosaic.version = 11 : i64} {
  func.func @kernel(%arg0: memref<16x32xf32, #tpu.memory_space<vmem>>, %arg1: memref<1x32xf32, #tpu.memory_space<vmem>>, %arg2: memref<1x32xf32, #tpu.memory_space<vmem>>, %arg3: memref<32x96xf32, #tpu.memory_space<vmem>>, %arg4: memref<1x96xf32, #tpu.memory_space<vmem>>, %arg5: memref<32x32xf32, #tpu.memory_space<vmem>>, %arg6: memref<1x32xf32, #tpu.memory_space<vmem>>, %arg7: memref<1x32xf32, #tpu.memory_space<vmem>>, %arg8: memref<1x32xf32, #tpu.memory_space<vmem>>, %arg9: memref<32x64xf32, #tpu.memory_space<vmem>>, %arg10: memref<1x64xf32, #tpu.memory_space<vmem>>, %arg11: memref<64x32xf32, #tpu.memory_space<vmem>>, %arg12: memref<1x32xf32, #tpu.memory_space<vmem>>, %arg13: memref<16x96xf32, #tpu.memory_space<vmem>>) attributes {dimension_semantics = [], scalar_prefetch = 0 : i64, scratch_operands = 0 : i64, tpu.core_type = #tpu.core_type<tc>} {
    %c0 = arith.constant 0 : index
    %c0_0 = arith.constant 0 : index
    %0 = vector.load %arg0[%c0, %c0_0] : memref<16x32xf32, #tpu.memory_space<vmem>>, vector<16x32xf32>
    %c0_1 = arith.constant 0 : index
    %c0_2 = arith.constant 0 : index
    %1 = vector.load %arg1[%c0_1, %c0_2] : memref<1x32xf32, #tpu.memory_space<vmem>>, vector<1x32xf32>
    %c0_3 = arith.constant 0 : index
    %c0_4 = arith.constant 0 : index
    %2 = vector.load %arg2[%c0_3, %c0_4] : memref<1x32xf32, #tpu.memory_space<vmem>>, vector<1x32xf32>
    %cst = arith.constant dense<0.000000e+00> : vector<16xf32>
    %3 = vector.multi_reduction <add>, %0, %cst [1] : vector<16x32xf32> to vector<16xf32>
    %4 = vector.shape_cast %3 : vector<16xf32> to vector<16x1xf32>
    %cst_5 = arith.constant 3.200000e+01 : f32
    %5 = vector.broadcast %cst_5 : f32 to vector<16x1xf32>
    %6 = arith.divf %4, %5 : vector<16x1xf32>
    %7 = vector.broadcast %6 : vector<16x1xf32> to vector<16x32xf32>
    %8 = arith.subf %0, %7 : vector<16x32xf32>
    %9 = arith.mulf %8, %8 : vector<16x32xf32>
    %cst_6 = arith.constant dense<0.000000e+00> : vector<16xf32>
    %10 = vector.multi_reduction <add>, %9, %cst_6 [1] : vector<16x32xf32> to vector<16xf32>
    %11 = vector.shape_cast %10 : vector<16xf32> to vector<16x1xf32>
    %cst_7 = arith.constant 3.200000e+01 : f32
    %12 = vector.broadcast %cst_7 : f32 to vector<16x1xf32>
    %13 = arith.divf %11, %12 : vector<16x1xf32>
    %14 = vector.broadcast %6 : vector<16x1xf32> to vector<16x32xf32>
    %15 = arith.subf %0, %14 : vector<16x32xf32>
    %cst_8 = arith.constant 9.99999974E-6 : f32
    %16 = vector.broadcast %cst_8 : f32 to vector<16x1xf32>
    %17 = arith.addf %13, %16 : vector<16x1xf32>
    %18 = math.rsqrt %17 : vector<16x1xf32>
    %19 = vector.broadcast %18 : vector<16x1xf32> to vector<16x32xf32>
    %20 = arith.mulf %15, %19 : vector<16x32xf32>
    %21 = vector.broadcast %1 : vector<1x32xf32> to vector<16x32xf32>
    %22 = arith.mulf %20, %21 : vector<16x32xf32>
    %23 = vector.broadcast %2 : vector<1x32xf32> to vector<16x32xf32>
    %24 = arith.addf %22, %23 : vector<16x32xf32>
    %c0_9 = arith.constant 0 : index
    %c0_10 = arith.constant 0 : index
    %25 = vector.load %arg3[%c0_9, %c0_10] : memref<32x96xf32, #tpu.memory_space<vmem>>, vector<32x96xf32>
    %cst_11 = arith.constant dense<0.000000e+00> : vector<16x96xf32>
    %26 = tpu.matmul %24, %25, %cst_11 {dimension_numbers = #tpu.dot_dimension_numbers<[1], [0], [0], [1], [0, 0, 1, 1], [], []>} : vector<16x32xf32>, vector<32x96xf32>, vector<16x96xf32> -> vector<16x96xf32>
    %c0_12 = arith.constant 0 : index
    %c0_13 = arith.constant 0 : index
    %27 = vector.load %arg4[%c0_12, %c0_13] : memref<1x96xf32, #tpu.memory_space<vmem>>, vector<1x96xf32>
    %28 = vector.broadcast %27 : vector<1x96xf32> to vector<16x96xf32>
    %29 = arith.addf %26, %28 : vector<16x96xf32>
    %30 = vector.extract_strided_slice %29 {offsets = [0, 32], sizes = [16, 64], strides = [1, 1]} : vector<16x96xf32> to vector<16x64xf32>
    %c0_14 = arith.constant 0 : index
    %c32 = arith.constant 32 : index
    %31 = vector.load %arg13[%c0_14, %c32] : memref<16x96xf32, #tpu.memory_space<vmem>>, vector<16x64xf32>
    tpu.vector_store %arg13[%c0_14, %c32], %30 {strides = array<i32>} : memref<16x96xf32, #tpu.memory_space<vmem>>, vector<16x64xf32>,
    %32 = vector.extract_strided_slice %29 {offsets = [0, 0], sizes = [16, 32], strides = [1, 1]} : vector<16x96xf32> to vector<16x32xf32>
    %cst_15 = arith.constant 0.353553385 : f32
    %33 = vector.broadcast %cst_15 : f32 to vector<16x32xf32>
    %34 = arith.mulf %32, %33 : vector<16x32xf32>
    %35 = vector.extract_strided_slice %29 {offsets = [0, 32], sizes = [16, 32], strides = [1, 1]} : vector<16x96xf32> to vector<16x32xf32>
    %36 = vector.extract_strided_slice %29 {offsets = [0, 64], sizes = [16, 32], strides = [1, 1]} : vector<16x96xf32> to vector<16x32xf32>
    %37 = tpu.iota {dimensions = array<i32: 0>} : vector<8x8xi32>
    %38 = tpu.iota {dimensions = array<i32: 1>} : vector<8x8xi32>
    %39 = arith.cmpi sle, %38, %37 : vector<8x8xi32>
    %cst_16 = arith.constant 0.000000e+00 : f32
    %cst_17 = arith.constant -1.000000e+30 : f32
    %40 = vector.broadcast %cst_16 : f32 to vector<8x8xf32>
    %41 = vector.broadcast %cst_17 : f32 to vector<8x8xf32>
    %42 = arith.select %39, %40, %41 : vector<8x8xi1>, vector<8x8xf32>
    %43 = vector.extract_strided_slice %34 {offsets = [0, 0], sizes = [16, 8], strides = [1, 1]} : vector<16x32xf32> to vector<16x8xf32>
    %44 = vector.shape_cast %43 : vector<16x8xf32> to vector<2x8x8xf32>
    %45 = vector.extract_strided_slice %35 {offsets = [0, 0], sizes = [16, 8], strides = [1, 1]} : vector<16x32xf32> to vector<16x8xf32>
    %46 = vector.shape_cast %45 : vector<16x8xf32> to vector<2x8x8xf32>
    %47 = vector.extract_strided_slice %36 {offsets = [0, 0], sizes = [16, 8], strides = [1, 1]} : vector<16x32xf32> to vector<16x8xf32>
    %48 = vector.shape_cast %47 : vector<16x8xf32> to vector<2x8x8xf32>
    "tpu.trace_start"() <{level = 10 : i32, message = "bqd,bkd->bqk"}> : () -> ()
    %cst_18 = arith.constant dense<0.000000e+00> : vector<2x8x8xf32>
    %49 = tpu.matmul %44, %46, %cst_18 {dimension_numbers = #tpu.dot_dimension_numbers<[2], [2], [1], [1], [0, 0, 0, 1, 1, 1], [0], [0]>} : vector<2x8x8xf32>, vector<2x8x8xf32>, vector<2x8x8xf32> -> vector<2x8x8xf32>
    "tpu.trace_stop"() : () -> ()
    %50 = vector.shape_cast %42 : vector<8x8xf32> to vector<1x8x8xf32>
    %51 = vector.broadcast %50 : vector<1x8x8xf32> to vector<2x8x8xf32>
    %52 = arith.addf %49, %51 : vector<2x8x8xf32>
    %cst_19 = arith.constant dense<0xFF800000> : vector<2x8xf32>
    %53 = vector.multi_reduction <maximumf>, %52, %cst_19 [2] : vector<2x8x8xf32> to vector<2x8xf32>
    %54 = vector.shape_cast %53 : vector<2x8xf32> to vector<2x8x1xf32>
    %55 = vector.broadcast %54 : vector<2x8x1xf32> to vector<2x8x8xf32>
    %56 = arith.subf %52, %55 : vector<2x8x8xf32>
    %57 = math.exp %56 : vector<2x8x8xf32>
    %cst_20 = arith.constant dense<0.000000e+00> : vector<2x8xf32>
    %58 = vector.multi_reduction <add>, %57, %cst_20 [2] : vector<2x8x8xf32> to vector<2x8xf32>
    %59 = vector.shape_cast %58 : vector<2x8xf32> to vector<2x8x1xf32>
    %60 = tpu.reciprocal %59 {approx = true} : vector<2x8x1xf32> -> vector<2x8x1xf32>
    %61 = vector.broadcast %60 : vector<2x8x1xf32> to vector<2x8x8xf32>
    %62 = arith.mulf %57, %61 : vector<2x8x8xf32>
    "tpu.trace_start"() <{level = 10 : i32, message = "bqk,bkd->bqd"}> : () -> ()
    %cst_21 = arith.constant dense<0.000000e+00> : vector<2x8x8xf32>
    %63 = tpu.matmul %62, %48, %cst_21 {dimension_numbers = #tpu.dot_dimension_numbers<[2], [1], [1], [2], [0, 0, 0, 1, 1, 2], [0], [0]>} : vector<2x8x8xf32>, vector<2x8x8xf32>, vector<2x8x8xf32> -> vector<2x8x8xf32>
    "tpu.trace_stop"() : () -> ()
    %64 = vector.shape_cast %63 : vector<2x8x8xf32> to vector<16x8xf32>
    %65 = vector.extract_strided_slice %34 {offsets = [0, 8], sizes = [16, 8], strides = [1, 1]} : vector<16x32xf32> to vector<16x8xf32>
    %66 = vector.shape_cast %65 : vector<16x8xf32> to vector<2x8x8xf32>
    %67 = vector.extract_strided_slice %35 {offsets = [0, 8], sizes = [16, 8], strides = [1, 1]} : vector<16x32xf32> to vector<16x8xf32>
    %68 = vector.shape_cast %67 : vector<16x8xf32> to vector<2x8x8xf32>
    %69 = vector.extract_strided_slice %36 {offsets = [0, 8], sizes = [16, 8], strides = [1, 1]} : vector<16x32xf32> to vector<16x8xf32>
    %70 = vector.shape_cast %69 : vector<16x8xf32> to vector<2x8x8xf32>
    "tpu.trace_start"() <{level = 10 : i32, message = "bqd,bkd->bqk"}> : () -> ()
    %cst_22 = arith.constant dense<0.000000e+00> : vector<2x8x8xf32>
    %71 = tpu.matmul %66, %68, %cst_22 {dimension_numbers = #tpu.dot_dimension_numbers<[2], [2], [1], [1], [0, 0, 0, 1, 1, 1], [0], [0]>} : vector<2x8x8xf32>, vector<2x8x8xf32>, vector<2x8x8xf32> -> vector<2x8x8xf32>
    "tpu.trace_stop"() : () -> ()
    %72 = vector.shape_cast %42 : vector<8x8xf32> to vector<1x8x8xf32>
    %73 = vector.broadcast %72 : vector<1x8x8xf32> to vector<2x8x8xf32>
    %74 = arith.addf %71, %73 : vector<2x8x8xf32>
    %cst_23 = arith.constant dense<0xFF800000> : vector<2x8xf32>
    %75 = vector.multi_reduction <maximumf>, %74, %cst_23 [2] : vector<2x8x8xf32> to vector<2x8xf32>
    %76 = vector.shape_cast %75 : vector<2x8xf32> to vector<2x8x1xf32>
    %77 = vector.broadcast %76 : vector<2x8x1xf32> to vector<2x8x8xf32>
    %78 = arith.subf %74, %77 : vector<2x8x8xf32>
    %79 = math.exp %78 : vector<2x8x8xf32>
    %cst_24 = arith.constant dense<0.000000e+00> : vector<2x8xf32>
    %80 = vector.multi_reduction <add>, %79, %cst_24 [2] : vector<2x8x8xf32> to vector<2x8xf32>
    %81 = vector.shape_cast %80 : vector<2x8xf32> to vector<2x8x1xf32>
    %82 = tpu.reciprocal %81 {approx = true} : vector<2x8x1xf32> -> vector<2x8x1xf32>
    %83 = vector.broadcast %82 : vector<2x8x1xf32> to vector<2x8x8xf32>
    %84 = arith.mulf %79, %83 : vector<2x8x8xf32>
    "tpu.trace_start"() <{level = 10 : i32, message = "bqk,bkd->bqd"}> : () -> ()
    %cst_25 = arith.constant dense<0.000000e+00> : vector<2x8x8xf32>
    %85 = tpu.matmul %84, %70, %cst_25 {dimension_numbers = #tpu.dot_dimension_numbers<[2], [1], [1], [2], [0, 0, 0, 1, 1, 2], [0], [0]>} : vector<2x8x8xf32>, vector<2x8x8xf32>, vector<2x8x8xf32> -> vector<2x8x8xf32>
    "tpu.trace_stop"() : () -> ()
    %86 = vector.shape_cast %85 : vector<2x8x8xf32> to vector<16x8xf32>
    %87 = vector.extract_strided_slice %34 {offsets = [0, 16], sizes = [16, 8], strides = [1, 1]} : vector<16x32xf32> to vector<16x8xf32>
    %88 = vector.shape_cast %87 : vector<16x8xf32> to vector<2x8x8xf32>
    %89 = vector.extract_strided_slice %35 {offsets = [0, 16], sizes = [16, 8], strides = [1, 1]} : vector<16x32xf32> to vector<16x8xf32>
    %90 = vector.shape_cast %89 : vector<16x8xf32> to vector<2x8x8xf32>
    %91 = vector.extract_strided_slice %36 {offsets = [0, 16], sizes = [16, 8], strides = [1, 1]} : vector<16x32xf32> to vector<16x8xf32>
    %92 = vector.shape_cast %91 : vector<16x8xf32> to vector<2x8x8xf32>
    "tpu.trace_start"() <{level = 10 : i32, message = "bqd,bkd->bqk"}> : () -> ()
    %cst_26 = arith.constant dense<0.000000e+00> : vector<2x8x8xf32>
    %93 = tpu.matmul %88, %90, %cst_26 {dimension_numbers = #tpu.dot_dimension_numbers<[2], [2], [1], [1], [0, 0, 0, 1, 1, 1], [0], [0]>} : vector<2x8x8xf32>, vector<2x8x8xf32>, vector<2x8x8xf32> -> vector<2x8x8xf32>
    "tpu.trace_stop"() : () -> ()
    %94 = vector.shape_cast %42 : vector<8x8xf32> to vector<1x8x8xf32>
    %95 = vector.broadcast %94 : vector<1x8x8xf32> to vector<2x8x8xf32>
    %96 = arith.addf %93, %95 : vector<2x8x8xf32>
    %cst_27 = arith.constant dense<0xFF800000> : vector<2x8xf32>
    %97 = vector.multi_reduction <maximumf>, %96, %cst_27 [2] : vector<2x8x8xf32> to vector<2x8xf32>
    %98 = vector.shape_cast %97 : vector<2x8xf32> to vector<2x8x1xf32>
    %99 = vector.broadcast %98 : vector<2x8x1xf32> to vector<2x8x8xf32>
    %100 = arith.subf %96, %99 : vector<2x8x8xf32>
    %101 = math.exp %100 : vector<2x8x8xf32>
    %cst_28 = arith.constant dense<0.000000e+00> : vector<2x8xf32>
    %102 = vector.multi_reduction <add>, %101, %cst_28 [2] : vector<2x8x8xf32> to vector<2x8xf32>
    %103 = vector.shape_cast %102 : vector<2x8xf32> to vector<2x8x1xf32>
    %104 = tpu.reciprocal %103 {approx = true} : vector<2x8x1xf32> -> vector<2x8x1xf32>
    %105 = vector.broadcast %104 : vector<2x8x1xf32> to vector<2x8x8xf32>
    %106 = arith.mulf %101, %105 : vector<2x8x8xf32>
    "tpu.trace_start"() <{level = 10 : i32, message = "bqk,bkd->bqd"}> : () -> ()
    %cst_29 = arith.constant dense<0.000000e+00> : vector<2x8x8xf32>
    %107 = tpu.matmul %106, %92, %cst_29 {dimension_numbers = #tpu.dot_dimension_numbers<[2], [1], [1], [2], [0, 0, 0, 1, 1, 2], [0], [0]>} : vector<2x8x8xf32>, vector<2x8x8xf32>, vector<2x8x8xf32> -> vector<2x8x8xf32>
    "tpu.trace_stop"() : () -> ()
    %108 = vector.shape_cast %107 : vector<2x8x8xf32> to vector<16x8xf32>
    %109 = vector.extract_strided_slice %34 {offsets = [0, 24], sizes = [16, 8], strides = [1, 1]} : vector<16x32xf32> to vector<16x8xf32>
    %110 = vector.shape_cast %109 : vector<16x8xf32> to vector<2x8x8xf32>
    %111 = vector.extract_strided_slice %35 {offsets = [0, 24], sizes = [16, 8], strides = [1, 1]} : vector<16x32xf32> to vector<16x8xf32>
    %112 = vector.shape_cast %111 : vector<16x8xf32> to vector<2x8x8xf32>
    %113 = vector.extract_strided_slice %36 {offsets = [0, 24], sizes = [16, 8], strides = [1, 1]} : vector<16x32xf32> to vector<16x8xf32>
    %114 = vector.shape_cast %113 : vector<16x8xf32> to vector<2x8x8xf32>
    "tpu.trace_start"() <{level = 10 : i32, message = "bqd,bkd->bqk"}> : () -> ()
    %cst_30 = arith.constant dense<0.000000e+00> : vector<2x8x8xf32>
    %115 = tpu.matmul %110, %112, %cst_30 {dimension_numbers = #tpu.dot_dimension_numbers<[2], [2], [1], [1], [0, 0, 0, 1, 1, 1], [0], [0]>} : vector<2x8x8xf32>, vector<2x8x8xf32>, vector<2x8x8xf32> -> vector<2x8x8xf32>
    "tpu.trace_stop"() : () -> ()
    %116 = vector.shape_cast %42 : vector<8x8xf32> to vector<1x8x8xf32>
    %117 = vector.broadcast %116 : vector<1x8x8xf32> to vector<2x8x8xf32>
    %118 = arith.addf %115, %117 : vector<2x8x8xf32>
    %cst_31 = arith.constant dense<0xFF800000> : vector<2x8xf32>
    %119 = vector.multi_reduction <maximumf>, %118, %cst_31 [2] : vector<2x8x8xf32> to vector<2x8xf32>
    %120 = vector.shape_cast %119 : vector<2x8xf32> to vector<2x8x1xf32>
    %121 = vector.broadcast %120 : vector<2x8x1xf32> to vector<2x8x8xf32>
    %122 = arith.subf %118, %121 : vector<2x8x8xf32>
    %123 = math.exp %122 : vector<2x8x8xf32>
    %cst_32 = arith.constant dense<0.000000e+00> : vector<2x8xf32>
    %124 = vector.multi_reduction <add>, %123, %cst_32 [2] : vector<2x8x8xf32> to vector<2x8xf32>
    %125 = vector.shape_cast %124 : vector<2x8xf32> to vector<2x8x1xf32>
    %126 = tpu.reciprocal %125 {approx = true} : vector<2x8x1xf32> -> vector<2x8x1xf32>
    %127 = vector.broadcast %126 : vector<2x8x1xf32> to vector<2x8x8xf32>
    %128 = arith.mulf %123, %127 : vector<2x8x8xf32>
    "tpu.trace_start"() <{level = 10 : i32, message = "bqk,bkd->bqd"}> : () -> ()
    %cst_33 = arith.constant dense<0.000000e+00> : vector<2x8x8xf32>
    %129 = tpu.matmul %128, %114, %cst_33 {dimension_numbers = #tpu.dot_dimension_numbers<[2], [1], [1], [2], [0, 0, 0, 1, 1, 2], [0], [0]>} : vector<2x8x8xf32>, vector<2x8x8xf32>, vector<2x8x8xf32> -> vector<2x8x8xf32>
    "tpu.trace_stop"() : () -> ()
    %130 = vector.shape_cast %129 : vector<2x8x8xf32> to vector<16x8xf32>
    %131 = tpu.concatenate %64, %86, %108, %130 in 1 : vector<16x8xf32>, vector<16x8xf32>, vector<16x8xf32>, vector<16x8xf32> -> vector<16x32xf32>
    %c0_34 = arith.constant 0 : index
    %c0_35 = arith.constant 0 : index
    %132 = vector.load %arg5[%c0_34, %c0_35] : memref<32x32xf32, #tpu.memory_space<vmem>>, vector<32x32xf32>
    %cst_36 = arith.constant dense<0.000000e+00> : vector<16x32xf32>
    %133 = tpu.matmul %131, %132, %cst_36 {dimension_numbers = #tpu.dot_dimension_numbers<[1], [0], [0], [1], [0, 0, 1, 1], [], []>} : vector<16x32xf32>, vector<32x32xf32>, vector<16x32xf32> -> vector<16x32xf32>
    %c0_37 = arith.constant 0 : index
    %c0_38 = arith.constant 0 : index
    %134 = vector.load %arg6[%c0_37, %c0_38] : memref<1x32xf32, #tpu.memory_space<vmem>>, vector<1x32xf32>
    %135 = vector.broadcast %134 : vector<1x32xf32> to vector<16x32xf32>
    %136 = arith.addf %133, %135 : vector<16x32xf32>
    %137 = arith.addf %0, %136 : vector<16x32xf32>
    %c0_39 = arith.constant 0 : index
    %c0_40 = arith.constant 0 : index
    %138 = vector.load %arg7[%c0_39, %c0_40] : memref<1x32xf32, #tpu.memory_space<vmem>>, vector<1x32xf32>
    %c0_41 = arith.constant 0 : index
    %c0_42 = arith.constant 0 : index
    %139 = vector.load %arg8[%c0_41, %c0_42] : memref<1x32xf32, #tpu.memory_space<vmem>>, vector<1x32xf32>
    %cst_43 = arith.constant dense<0.000000e+00> : vector<16xf32>
    %140 = vector.multi_reduction <add>, %137, %cst_43 [1] : vector<16x32xf32> to vector<16xf32>
    %141 = vector.shape_cast %140 : vector<16xf32> to vector<16x1xf32>
    %cst_44 = arith.constant 3.200000e+01 : f32
    %142 = vector.broadcast %cst_44 : f32 to vector<16x1xf32>
    %143 = arith.divf %141, %142 : vector<16x1xf32>
    %144 = vector.broadcast %143 : vector<16x1xf32> to vector<16x32xf32>
    %145 = arith.subf %137, %144 : vector<16x32xf32>
    %146 = arith.mulf %145, %145 : vector<16x32xf32>
    %cst_45 = arith.constant dense<0.000000e+00> : vector<16xf32>
    %147 = vector.multi_reduction <add>, %146, %cst_45 [1] : vector<16x32xf32> to vector<16xf32>
    %148 = vector.shape_cast %147 : vector<16xf32> to vector<16x1xf32>
    %cst_46 = arith.constant 3.200000e+01 : f32
    %149 = vector.broadcast %cst_46 : f32 to vector<16x1xf32>
    %150 = arith.divf %148, %149 : vector<16x1xf32>
    %151 = vector.broadcast %143 : vector<16x1xf32> to vector<16x32xf32>
    %152 = arith.subf %137, %151 : vector<16x32xf32>
    %cst_47 = arith.constant 9.99999974E-6 : f32
    %153 = vector.broadcast %cst_47 : f32 to vector<16x1xf32>
    %154 = arith.addf %150, %153 : vector<16x1xf32>
    %155 = math.rsqrt %154 : vector<16x1xf32>
    %156 = vector.broadcast %155 : vector<16x1xf32> to vector<16x32xf32>
    %157 = arith.mulf %152, %156 : vector<16x32xf32>
    %158 = vector.broadcast %138 : vector<1x32xf32> to vector<16x32xf32>
    %159 = arith.mulf %157, %158 : vector<16x32xf32>
    %160 = vector.broadcast %139 : vector<1x32xf32> to vector<16x32xf32>
    %161 = arith.addf %159, %160 : vector<16x32xf32>
    %c0_48 = arith.constant 0 : index
    %c0_49 = arith.constant 0 : index
    %162 = vector.load %arg9[%c0_48, %c0_49] : memref<32x64xf32, #tpu.memory_space<vmem>>, vector<32x64xf32>
    %cst_50 = arith.constant dense<0.000000e+00> : vector<16x64xf32>
    %163 = tpu.matmul %161, %162, %cst_50 {dimension_numbers = #tpu.dot_dimension_numbers<[1], [0], [0], [1], [0, 0, 1, 1], [], []>} : vector<16x32xf32>, vector<32x64xf32>, vector<16x64xf32> -> vector<16x64xf32>
    %c0_51 = arith.constant 0 : index
    %c0_52 = arith.constant 0 : index
    %164 = vector.load %arg10[%c0_51, %c0_52] : memref<1x64xf32, #tpu.memory_space<vmem>>, vector<1x64xf32>
    %165 = vector.broadcast %164 : vector<1x64xf32> to vector<16x64xf32>
    %166 = arith.addf %163, %165 : vector<16x64xf32>
    %cst_53 = arith.constant 5.000000e-01 : f32
    %167 = vector.broadcast %cst_53 : f32 to vector<16x64xf32>
    %168 = arith.mulf %167, %166 : vector<16x64xf32>
    %cst_54 = arith.constant 4.471500e-02 : f32
    %169 = vector.broadcast %cst_54 : f32 to vector<16x64xf32>
    %170 = arith.mulf %169, %166 : vector<16x64xf32>
    %171 = arith.mulf %170, %166 : vector<16x64xf32>
    %172 = arith.mulf %171, %166 : vector<16x64xf32>
    %173 = arith.addf %166, %172 : vector<16x64xf32>
    %cst_55 = arith.constant 0.797884583 : f32
    %174 = vector.broadcast %cst_55 : f32 to vector<16x64xf32>
    %175 = arith.mulf %174, %173 : vector<16x64xf32>
    %176 = math.tanh %175 : vector<16x64xf32>
    %cst_56 = arith.constant 1.000000e+00 : f32
    %177 = vector.broadcast %cst_56 : f32 to vector<16x64xf32>
    %178 = arith.addf %177, %176 : vector<16x64xf32>
    %179 = arith.mulf %168, %178 : vector<16x64xf32>
    %c0_57 = arith.constant 0 : index
    %c0_58 = arith.constant 0 : index
    %180 = vector.load %arg11[%c0_57, %c0_58] : memref<64x32xf32, #tpu.memory_space<vmem>>, vector<64x32xf32>
    %cst_59 = arith.constant dense<0.000000e+00> : vector<16x32xf32>
    %181 = tpu.matmul %179, %180, %cst_59 {dimension_numbers = #tpu.dot_dimension_numbers<[1], [0], [0], [1], [0, 0, 1, 1], [], []>} : vector<16x64xf32>, vector<64x32xf32>, vector<16x32xf32> -> vector<16x32xf32>
    %c0_60 = arith.constant 0 : index
    %c0_61 = arith.constant 0 : index
    %182 = vector.load %arg12[%c0_60, %c0_61] : memref<1x32xf32, #tpu.memory_space<vmem>>, vector<1x32xf32>
    %183 = vector.broadcast %182 : vector<1x32xf32> to vector<16x32xf32>
    %184 = arith.addf %181, %183 : vector<16x32xf32>
    %185 = arith.addf %137, %184 : vector<16x32xf32>
    %c0_62 = arith.constant 0 : index
    %c0_63 = arith.constant 0 : index
    %186 = vector.load %arg13[%c0_62, %c0_63] : memref<16x96xf32, #tpu.memory_space<vmem>>, vector<16x32xf32>
    tpu.vector_store %arg13[%c0_62, %c0_63], %185 {strides = array<i32>} : memref<16x96xf32, #tpu.memory_space<vmem>>, vector<16x32xf32>,
    return
  }
}

</mosaic_0001>

<bundles_post_ra>
// kernel: block_forward.1
= control target key start
LH: loop header
LB: loop body
LE: loop exit
PB: predicated region body
PF: predicated region fallthrough
CT: control target
= control target key end

     0   :  { %18 = vsyncpa [#allocation3], 0  ;;  %s1521_s0 = inlined_call_operand.hbm [shape: f32[16,32], index: 0, kind: input, shape index: {}]   ;;  %s1522_s1 = inlined_call_operand.vmem [shape: f32[1,32], index: 1, kind: input, shape index: {}]   ;;  %s1523_s2 = inlined_call_operand.vmem [shape: f32[1,32], index: 2, kind: input, shape index: {}]   ;;  %s1524_s3 = inlined_call_operand.vmem [shape: f32[32,96], index: 3, kind: input, shape index: {}]   ;;  %s1525_s4 = inlined_call_operand.vmem [shape: f32[1,96], index: 4, kind: input, shape index: {}]   ;;  %s1526_s5 = inlined_call_operand.vmem [shape: f32[32,32], index: 5, kind: input, shape index: {}]   ;;  %s1527_s6 = inlined_call_operand.hbm [shape: f32[1,32], index: 6, kind: input, shape index: {}]   ;;  %s1528_s7 = inlined_call_operand.vmem [shape: f32[1,32], index: 7, kind: input, shape index: {}]   ;;  %s1529_s8 = inlined_call_operand.vmem [shape: f32[1,32], index: 8, kind: input, shape index: {}]   ;;  %s1530_s9 = inlined_call_operand.vmem [shape: f32[32,64], index: 9, kind: input, shape index: {}]   ;;  %s1531_s10 = inlined_call_operand.hbm [shape: f32[1,64], index: 10, kind: input, shape index: {}]   ;;  %s1532_s11 = inlined_call_operand.vmem [shape: f32[64,32], index: 11, kind: input, shape index: {}]   ;;  %s1533_s12 = inlined_call_operand.hbm [shape: f32[1,32], index: 12, kind: input, shape index: {}]   ;;  %s1534_s13 = inlined_call_operand.vmem [shape: f32[16,96], index: 13, kind: output, shape index: {}]  }
   0x1   :  { %19 = vsyncpa [#allocation5], 0  ;;  %s49_s27 = sshll.u32 %s1527_s6, 4  ;;  %s50_s27 = int_to_ptr.hbm [resolvable:$true] %s49_s27 }
   0x2   :  { %20 = vsyncpa [#allocation8], 0  ;;  %s1185_s28 = smov [#allocation4]   ;;  %s25_s15 = sshll.u32 %s1521_s0, 4  ;;  %s26_s15 = int_to_ptr.hbm [resolvable:$true] %s25_s15 }
   0x3   :  { %s51_s29 = sshll.u32 %s1185_s28, 4  ;;  %s1186_s16 = smov [#allocation2]   ;;  %s52_s29 = int_to_ptr.vmem [resolvable:$true] %s51_s29 }
   0x4   :  { %54 = dma.hbm_to_vmem [thread:$0]  %s50_s27, 16, %s52_s29, [#allocation5]  }
   0x5   :  { %s27_s17 = sshll.u32 %s1186_s16, 4  ;;  %s1187_s18 = smov 128   ;;  %s28_s17 = int_to_ptr.vmem [resolvable:$true] %s27_s17 }
   0x6   :  { %s1188_s19 = smov 8   ;;  %s66_s21 = sshll.u32 %s1531_s10, 4  ;;  %s67_s21 = int_to_ptr.hbm [resolvable:$true] %s66_s21 }
   0x7   :  { %33 = dma.hbm_to_vmem [thread:$0]  %s26_s15, 256, %s28_s17, [#allocation3], %s1187_s18, %s1187_s18, %s1188_s19  }
   0x8   :  { %s1189_s22 = smov [#allocation6]   ;;  %s79_s0 = sshll.u32 %s1533_s12, 4  ;;  %s80_s0 = int_to_ptr.hbm [resolvable:$true] %s79_s0 }
   0x9   :  { %s68_s23 = sshll.u32 %s1189_s22, 4  ;;  %s1190_s26 = smov [#allocation7]   ;;  %s69_s23 = int_to_ptr.vmem [resolvable:$true] %s68_s23 }
   0xa   :  { %71 = dma.hbm_to_vmem [thread:$0]  %s67_s21, 16, %s69_s23, [#allocation5]  }
   0xb   :  { %s81_s27 = sshll.u32 %s1190_s26, 4  ;;  %s82_s27 = int_to_ptr.vmem [resolvable:$true] %s81_s27 }
   0xc   :  { %84 = dma.hbm_to_vmem [thread:$0]  %s80_s0, 16, %s82_s27, [#allocation8]  }
   0xd   :  { %1179 = dma.done.wait [#allocation3], 256  }
   0xe   :  { %1180 = vsyncadd [#allocation3], 4294967040 }
   0xf   :  { %1181 = dma.done.wait [#allocation5], 32  }
  0x10   :  { %1182 = vsyncadd [#allocation5], 4294967264 }
  0x11   :  { %1183 = dma.done.wait [#allocation8], 16  }
  0x12   :  { %1184 = vsyncadd [#allocation8], 4294967280  ;;  %vm105_vm0 = vcmask 261120   ;;  %v1289_v0 = vld [vmem:[#allocation2] sm:$0xff]  ;;  %v1291_v1 = vld [vmem:[#allocation2 + $0x8] sm:$0xff]  ;;  %v1191_v4 = vmov 32.0  }
  0x13   :  { %v106_v2 = vsel %vm105_vm0, %v1289_v0, 0.0  ;;  %v109_v3 = vsel %vm105_vm0, %v1291_v1, 0.0  ;;  %1037 = vrcp.f32 %v1191_v4  ;;  %v170_v21 = vld [vmem:[%s1524_s3 + $0x18] sm:$0xff]  ;;  %v169_v22 = vld [vmem:[%s1524_s3 + $0x10] sm:$0xff]  ;;  %v168_v23 = vld [vmem:[%s1524_s3 + $0x8] sm:$0xff]  ;;  %vm204_vm8 = vcmask 785664  }
  0x14   :  { %107 = vadd.xlane.f32.xlu0 %v106_v2  ;;  %110 = vadd.xlane.f32.xlu1 %v109_v3  ;;  %v167_v24 = vld [vmem:[%s1524_s3] sm:$0xff]  ;;  %s1195_s24 = smov 88   ;;  %s1196_s26 = smov 72   ;;  %vm218_vm9 = vcmask 64512   ;;  %v209_v2 = vlaneseq  ;;  %vm762_vm11 = vcmask 130048   ;;  %vm765_vm12 = vcmask 195584  }
  0x15   :  { %193 = vmatpush.msra.mxu0 %v170_v21  ;;  %v1029_v43 = vld [vmem:[%s1522_s1] ss:$0 sm:$0xff]  ;;  %s1192_s1 = smov 64   ;;  %s1197_s27 = smov 112  }
  0x16   :  { %v1030_v47 = vld [vmem:[%s1523_s2] ss:$0 sm:$0xff]  ;;  %s1193_s2 = smov 96   ;;  %s1198_s10 = smov 104   ;;  %v210_v3 = vshrl.u32 %v209_v2, 7  ;;  %v212_v4 = vand.u32 127, %v209_v2 }
  0x17   :  { %194 = vmatpush.msra.mxu0 %v169_v22  ;;  %v1031_v53 = vld [vmem:[%s1525_s4] ss:$0 sm:$0xff]  ;;  %s1194_s4 = smov 80   ;;  %s1200_s12 = smov 120  }
  0x18   :  { %vm213_vm10 = vcmp.le.s32.totalorder %v212_v4, %v210_v3  ;;  %s1201_s28 = smov 48   ;;  %s1202_s29 = smov 40  }
  0x19   :  { %v1038_v5 = vpop.eup %1037  ;;  %195 = vmatpush.msra.mxu0 %v168_v23  ;;  %s1203_s30 = smov 56   ;;  %s1204_s14 = smov 16  }
  0x1a   :  { %v113_v6 = vmul.f32 32.0, %v1038_v5  ;;  %vm117_vm1 = vweird.f32 %v1038_v5  ;;  %s1205_s15 = smov 24  }
  0x1b   :  { %196 = vmatpush.msra.mxu0 %v167_v24 }
  0x1c   :  { %v114_v7 = vsub.f32 1.0, %v113_v6 }
  0x1e   :  { %v115_v8 = vmul.f32 %v1038_v5, %v114_v7 }
  0x20   :  { %v116_v9 = vadd.f32 %v1038_v5, %v115_v8 }
  0x22   :  { %v1297_v10 = vsel %vm117_vm1, %v1038_v5, %v116_v9  ;;  %v1199_v5 = vmov -1e+30  }
  0x23   :  { %v1358_v6 = vsel %vm213_vm10, 0.0, %v1199_v5 }
  0x87   :  { %v108_v11 = vpop.xlane.xlu0 %107  ;;  %v111_v12 = vpop.xlane.xlu1 %110 }
  0x88   :  { %v119_v13 = vmul.f32 %v1297_v10, %v108_v11  ;;  %v120_v14 = vmul.f32 %v1297_v10, %v111_v12 }
  0x8a   :  { %v121_v15 = vsub.f32 %v1289_v0, %v119_v13  ;;  %v122_v16 = vsub.f32 %v1291_v1, %v120_v14 }
  0x8c   :  { %v123_v17 = vmul.f32 %v121_v15, %v121_v15  ;;  %v124_v18 = vmul.f32 %v122_v16, %v122_v16 }
  0x8e   :  { %v125_v19 = vsel %vm105_vm0, %v123_v17, 0.0  ;;  %v128_v20 = vsel %vm105_vm0, %v124_v18, 0.0 }
  0x8f   :  { %126 = vadd.xlane.f32.xlu0 %v125_v19  ;;  %129 = vadd.xlane.f32.xlu2 %v128_v20 }
 0x102   :  { %v127_v25 = vpop.xlane.xlu0 %126  ;;  %v130_v26 = vpop.xlane.xlu2 %129 }
 0x103   :  { %v131_v27 = vmul.f32 %v127_v25, %v1297_v10  ;;  %v132_v28 = vmul.f32 %v130_v26, %v1297_v10 }
 0x105   :  { %v133_v29 = vadd.f32 1e-05, %v131_v27  ;;  %v134_v30 = vadd.f32 1e-05, %v132_v28 }
 0x107   :  { %1039 = vrsqrt.f32 %v133_v29  ;;  %vm151_vm2 = vweird.f32 %v134_v30  ;;  %vm141_vm5 = vweird.f32 %v133_v29 }
 0x108   :  { %1041 = vrsqrt.f32 %v134_v30 }
 0x10d   :  { %v1040_v31 = vpop.eup %1039 }
 0x10e   :  { %v1042_v32 = vpop.eup %1041  ;;  %v136_v33 = vmul.f32 %v1040_v31, %v133_v29  ;;  %vm142_vm4 = vweird.f32 %v1040_v31 }
 0x10f   :  { %v146_v34 = vmul.f32 %v1042_v32, %v134_v30  ;;  %vm152_vm3 = vweird.f32 %v1042_v32  ;;  %vm143_vm7 = vmor %vm141_vm5, %vm142_vm4  ;;  %vm930_vm4 = vcmask 523264  }
 0x110   :  { %v137_v35 = vmul.f32 %v1040_v31, %v136_v33  ;;  %vm153_vm6 = vmor %vm151_vm2, %vm152_vm3 }
 0x111   :  { %v147_v36 = vmul.f32 %v1042_v32, %v146_v34 }
 0x112   :  { %v138_v37 = vmul.f32 0.5, %v137_v35 }
 0x113   :  { %v148_v38 = vmul.f32 0.5, %v147_v36 }
 0x114   :  { %v139_v39 = vsub.f32 1.5, %v138_v37 }
 0x115   :  { %v149_v40 = vsub.f32 1.5, %v148_v38 }
 0x116   :  { %v140_v41 = vmul.f32 %v1040_v31, %v139_v39 }
 0x117   :  { %v150_v42 = vmul.f32 %v1042_v32, %v149_v40 }
 0x118   :  { %v144_v44 = vsel %vm143_vm7, %v1040_v31, %v140_v41 }
 0x119   :  { %v154_v45 = vsel %vm153_vm6, %v1042_v32, %v150_v42  ;;  %v155_v46 = vmul.f32 %v144_v44, %v121_v15 }
 0x11a   :  { %v156_v49 = vmul.f32 %v154_v45, %v122_v16 }
 0x11b   :  { %v160_v48 = vmul.f32 %v1029_v43, %v155_v46 }
 0x11c   :  { %v161_v51 = vmul.f32 %v1029_v43, %v156_v49 }
 0x11d   :  { %v165_v50 = vadd.f32 %v1030_v47, %v160_v48 }
 0x11e   :  { %v166_v52 = vadd.f32 %v1030_v47, %v161_v51 }
 0x11f   :  { %971 = vmatmul.msk.f32.vlgmr.msra.gmra.mxu0 %vm105_vm0, %v165_v50 }
 0x127   :  { %972 = vmatmul.msk.f32.gmra.mxu0 %vm105_vm0, %v166_v52 }
 0x19c   :  { %v198_v54 = vpop.f32.mrf.mxu0 }
 0x19d   :  { %v1330_v55 = vadd.f32 %v1031_v53, %v198_v54 }
 0x19f   :  { %294 = vrot.lane.b32.xlu0 %v1330_v55, %s1192_s1  ;;  %216 = vrot.lane.b32.xlu1 %v1330_v55, %s1193_s2  ;;  %205 = vst.msk [vmem:[%s1534_s13] sm:$0xff] %vm204_vm8, %v1330_v55  ;;  %v207_v58 = vmul.f32 0.35355338, %v1330_v55 }
 0x1a4   :  { %v201_v56 = vpop.f32.mrf.mxu0 }
 0x1a5   :  { %v1340_v57 = vadd.f32 %v1031_v53, %v201_v56 }
 0x1a7   :  { %478 = vrot.lane.b32.xlu0 %v1330_v55, %s1194_s4  ;;  %376 = vrot.lane.b32.xlu1 %v1340_v57, %s1195_s24  ;;  %206 = vst.msk [vmem:[%s1534_s13 + $0x8] sm:$0xff] %vm204_vm8, %v1340_v57  ;;  %v208_v59 = vmul.f32 0.35355338, %v1340_v57 }
 0x1af   :  { %608 = vrot.lane.b32.xlu0 %v1330_v55, %s1196_s26  ;;  %348 = vrot.lane.b32.xlu1 %v1330_v55, %s1195_s24 }
 0x1b7   :  { %476 = vrot.lane.b32.xlu1 %v207_v58, %s1197_s27 }
 0x1bf   :  { %506 = vrot.lane.b32.xlu1 %v1340_v57, %s1194_s4 }
 0x1c7   :  { %634 = vrot.lane.b32.xlu1 %v208_v59, %s1198_s10 }
 0x211   :  { %v295_v60 = vpop.permute.xlu0 %294  ;;  %v217_v61 = vpop.permute.xlu1 %216 }
 0x212   :  { %973 = vmatpush.xpose.msk.msra.mxu1 %vm218_vm9, %v217_v61 }
 0x215   :  { %974 = vmatmul.msk.f32.vlgmr.msra.gmra.mxu1 %vm218_vm9, %v207_v58 }
 0x216   :  { %315 = vmatpush.msrb.mxu1 %v295_v60 }
 0x219   :  { %v377_v62 = vpop.permute.xlu1 %376  ;;  %v479_v17 = vpop.permute.xlu0 %478 }
 0x221   :  { %v349_v63 = vpop.permute.xlu1 %348  ;;  %v609_v21 = vpop.permute.xlu0 %608 }
 0x222   :  { %979 = vmatpush.xpose.msk.msra.mxu1 %vm218_vm9, %v349_v63 }
 0x229   :  { %v477_v11 = vpop.permute.xlu1 %476 }
 0x231   :  { %v507_v12 = vpop.permute.xlu1 %506 }
 0x232   :  { %987 = vmatpush.xpose.msk.msrb.mxu0 %vm218_vm9, %v507_v12 }
 0x239   :  { %v635_v35 = vpop.permute.xlu1 %634 }
 0x292   :  { %v241_v7 = vpop.f32.mrf.mxu1 }
 0x293   :  { %v242_v8 = vadd.f32 %v241_v7, %v1358_v6 }
 0x295   :  { %v272_v9 = vsel %vm218_vm9, %v242_v8, -inf }
 0x296   :  { %273 = vmax.xlane.f32.xlu2 %v272_v9 }
 0x2ae   :  { %245 = vrot.lane.b32.xlu2 %v1340_v57, %s1193_s2 }
 0x2b6   :  { %374 = vrot.lane.b32.xlu2 %v208_v59, %s1200_s12 }
 0x2be   :  { %346 = vrot.lane.b32.xlu2 %v207_v58, %s1200_s12 }
 0x2c6   :  { %606 = vrot.lane.b32.xlu2 %v207_v58, %s1198_s10 }
 0x2ce   :  { %636 = vrot.lane.b32.xlu2 %v1340_v57, %s1196_s26 }
 0x309   :  { %v274_v13 = vpop.xlane.xlu2 %273 }
 0x30a   :  { %v278_v14 = vsub.f32 %v242_v8, %v274_v13 }
 0x30c   :  { %v280_v15 = vmul.f32 1.442695, %v278_v14 }
 0x30e   :  { %1043 = vpow2.f32 %v280_v15 }
 0x311   :  { %v246_v16 = vpop.permute.xlu2 %245 }
 0x312   :  { %975 = vmatpush.xpose.msk.msra.mxu2 %vm218_vm9, %v246_v16 }
 0x314   :  { %v1044_v18 = vpop.eup %1043 }
 0x315   :  { %976 = vmatmul.msk.f32.vlgmr.msra.gmra.mxu2 %vm218_vm9, %v208_v59  ;;  %v284_v19 = vsel %vm218_vm9, %v1044_v18, 0.0 }
 0x316   :  { %981 = vmatpush.xpose.msk.msrb.mxu2 %vm218_vm9, %v377_v62  ;;  %285 = vadd.xlane.f32.xlu0 %v284_v19 }
 0x319   :  { %v375_v20 = vpop.permute.xlu2 %374 }
 0x31a   :  { %985 = vmatpush.xpose.msk.msra.mxu2 %vm218_vm9, %v479_v17 }
 0x31d   :  { %982 = vmatmul.msk.f32.vlgmr.msrb.gmra.mxu2 %vm218_vm9, %v375_v20 }
 0x31e   :  { %991 = vmatpush.xpose.msk.msrb.mxu2 %vm218_vm9, %v609_v21 }
 0x321   :  { %v347_v22 = vpop.permute.xlu2 %346 }
 0x325   :  { %986 = vmatmul.msk.f32.vlgmr.msra.gmra.mxu2 %vm218_vm9, %v477_v11 }
 0x329   :  { %v607_v23 = vpop.permute.xlu2 %606 }
 0x32a   :  { %504 = vrot.lane.b32.xlu0 %v208_v59, %s1197_s27 }
 0x32d   :  { %992 = vmatmul.msk.f32.vlgmr.msrb.gmra.mxu2 %vm218_vm9, %v607_v23 }
 0x331   :  { %v637_v24 = vpop.permute.xlu2 %636 }
 0x332   :  { %993 = vmatpush.xpose.msk.msra.mxu0 %vm218_vm9, %v637_v24 }
 0x389   :  { %v286_v25 = vpop.xlane.xlu0 %285 }
 0x38a   :  { %1045 = vrcp.f32 %v286_v25 }
 0x390   :  { %v1046_v26 = vpop.eup %1045 }
 0x391   :  { %v292_v27 = vmul.f32 %v1046_v26, %v1044_v18 }
 0x393   :  { %977 = vmatmul.msk.f32.vlgmr.msrb.gmra.mxu1 %vm218_vm9, %v292_v27 }
 0x398   :  { %v269_v28 = vpop.f32.mrf.mxu2 }
 0x399   :  { %v270_v29 = vadd.f32 %v269_v28, %v1358_v6  ;;  %v1024_v28 = vpack.i.bf16 %v1340_v57, %v1330_v55 }
 0x39b   :  { %980 = vmatmul.msk.f32.vlgmr.msra.gmra.mxu1 %vm218_vm9, %v347_v22  ;;  %v275_v30 = vsel %vm218_vm9, %v270_v29, -inf }
 0x39c   :  { %v505_v31 = vpop.permute.xlu0 %504  ;;  %276 = vmax.xlane.f32.xlu0 %v275_v30 }
 0x39d   :  { %988 = vmatmul.msk.f32.vlgmr.msrb.gmra.mxu0 %vm218_vm9, %v505_v31 }
 0x3a0   :  { %v399_v32 = vpop.f32.mrf.mxu2 }
 0x3a1   :  { %v400_v33 = vadd.f32 %v399_v32, %v1358_v6 }
 0x3a3   :  { %v405_v34 = vsel %vm218_vm9, %v400_v33, -inf }
 0x3a4   :  { %406 = vmax.xlane.f32.xlu0 %v405_v34 }
 0x3a5   :  { %994 = vmatmul.msk.f32.vlgmr.msra.gmra.mxu0 %vm218_vm9, %v635_v35 }
 0x3a8   :  { %v501_v36 = vpop.f32.mrf.mxu2 }
 0x3a9   :  { %v502_v37 = vadd.f32 %v501_v36, %v1358_v6 }
 0x3ab   :  { %v532_v38 = vsel %vm218_vm9, %v502_v37, -inf }
 0x3ac   :  { %533 = vmax.xlane.f32.xlu1 %v532_v38 }
 0x3b0   :  { %v631_v47 = vpop.f32.mrf.mxu2 }
 0x3b1   :  { %v632_v50 = vadd.f32 %v631_v47, %v1358_v6 }
 0x3b3   :  { %v662_v56 = vsel %vm218_vm9, %v632_v50, -inf }
 0x40f   :  { %v277_v40 = vpop.xlane.xlu0 %276 }
 0x410   :  { %v1388_v39 = vpop.f32.mrf.mxu1  ;;  %v279_v43 = vsub.f32 %v270_v29, %v277_v40 }
 0x412   :  { %v282_v49 = vmul.f32 1.442695, %v279_v43 }
 0x414   :  { %1047 = vpow2.f32 %v282_v49 }
 0x417   :  { %v407_v60 = vpop.xlane.xlu0 %406 }
 0x418   :  { %v371_v41 = vpop.f32.mrf.mxu1  ;;  %v409_v62 = vsub.f32 %v400_v33, %v407_v60 }
 0x419   :  { %v372_v42 = vadd.f32 %v371_v41, %v1358_v6 }
 0x41a   :  { %v529_v44 = vpop.f32.mrf.mxu0  ;;  %v1048_v61 = vpop.eup %1047  ;;  %v412_v2 = vmul.f32 1.442695, %v409_v62 }
 0x41b   :  { %v530_v45 = vadd.f32 %v529_v44, %v1358_v6  ;;  %v402_v46 = vsel %vm218_vm9, %v372_v42, -inf  ;;  %v287_v63 = vsel %vm218_vm9, %v1048_v61, 0.0 }
 0x41c   :  { %403 = vmax.xlane.f32.xlu2 %v402_v46 }
 0x41d   :  { %v535_v48 = vsel %vm218_vm9, %v530_v45, -inf }
 0x41e   :  { %536 = vmax.xlane.f32.xlu1 %v535_v48 }
 0x41f   :  { %v534_v51 = vpop.xlane.xlu1 %533 }
 0x420   :  { %v538_v52 = vsub.f32 %v502_v37, %v534_v51 }
 0x422   :  { %v659_v53 = vpop.f32.mrf.mxu0  ;;  %v540_v59 = vmul.f32 1.442695, %v538_v52 }
 0x423   :  { %v660_v54 = vadd.f32 %v659_v53, %v1358_v6 }
 0x424   :  { %663 = vmax.xlane.f32.xlu2 %v662_v56  ;;  %1049 = vpow2.f32 %v540_v59 }
 0x425   :  { %v665_v58 = vsel %vm218_vm9, %v660_v54, -inf  ;;  %1051 = vpow2.f32 %v412_v2 }
 0x426   :  { %666 = vmax.xlane.f32.xlu0 %v665_v58 }
 0x42a   :  { %v1399_v3 = vpop.eup %1049 }
 0x42b   :  { %v544_v4 = vsel %vm218_vm9, %v1399_v3, 0.0  ;;  %v1403_v5 = vpop.eup %1051 }
 0x42c   :  { %288 = vadd.xlane.f32.xlu2 %v287_v63  ;;  %v417_v6 = vsel %vm218_vm9, %v1403_v5, 0.0 }
 0x434   :  { %545 = vadd.xlane.f32.xlu2 %v544_v4  ;;  %v771_v4 = vld [vmem:[%s1526_s5 + $0x18] sm:$0xff] }
 0x435   :  { %794 = vmatpush.msra.mxu2 %v771_v4 }
 0x43a   :  { %320 = vrot.lane.b32.xlu0 %v1340_v57, %s1192_s1 }
 0x43c   :  { %418 = vadd.xlane.f32.xlu2 %v417_v6  ;;  %v769_v6 = vld [vmem:[%s1526_s5 + $0x8] sm:$0xff] }
 0x442   :  { %554 = vrot.lane.b32.xlu0 %v1330_v55, %s1201_s28 }
 0x44a   :  { %684 = vrot.lane.b32.xlu0 %v1330_v55, %s1202_s29 }
 0x452   :  { %710 = vrot.lane.b32.xlu0 %v1340_v57, %s1202_s29 }
 0x48f   :  { %v404_v7 = vpop.xlane.xlu2 %403 }
 0x490   :  { %v408_v8 = vsub.f32 %v372_v42, %v404_v7  ;;  %v768_v7 = vld [vmem:[%s1526_s5] sm:$0xff] }
 0x491   :  { %v537_v11 = vpop.xlane.xlu1 %536 }
 0x492   :  { %v410_v9 = vmul.f32 1.442695, %v408_v8  ;;  %v539_v15 = vsub.f32 %v530_v45, %v537_v11 }
 0x494   :  { %1053 = vpow2.f32 %v410_v9  ;;  %v542_v18 = vmul.f32 1.442695, %v539_v15 }
 0x497   :  { %v664_v12 = vpop.xlane.xlu2 %663 }
 0x498   :  { %v668_v13 = vsub.f32 %v632_v50, %v664_v12 }
 0x499   :  { %v667_v22 = vpop.xlane.xlu0 %666 }
 0x49a   :  { %v1054_v14 = vpop.eup %1053  ;;  %v670_v16 = vmul.f32 1.442695, %v668_v13  ;;  %v669_v29 = vsub.f32 %v660_v54, %v667_v22 }
 0x49b   :  { %v414_v17 = vsel %vm218_vm9, %v1054_v14, 0.0 }
 0x49c   :  { %1055 = vpow2.f32 %v670_v16  ;;  %415 = vadd.xlane.f32.xlu1 %v414_v17  ;;  %v672_v30 = vmul.f32 1.442695, %v669_v29 }
 0x49d   :  { %1057 = vpow2.f32 %v542_v18 }
 0x49f   :  { %v289_v19 = vpop.xlane.xlu2 %288 }
 0x4a0   :  { %1059 = vrcp.f32 %v289_v19 }
 0x4a1   :  { %1061 = vpow2.f32 %v672_v30 }
 0x4a2   :  { %v1056_v20 = vpop.eup %1055 }
 0x4a3   :  { %v674_v21 = vsel %vm218_vm9, %v1056_v20, 0.0  ;;  %v1058_v23 = vpop.eup %1057 }
 0x4a4   :  { %675 = vadd.xlane.f32.xlu2 %v674_v21  ;;  %v547_v25 = vsel %vm218_vm9, %v1058_v23, 0.0  ;;  %v1032_v21 = vld [vmem:[#allocation4] ss:$0 sm:$0xff] }
 0x4a6   :  { %v1060_v24 = vpop.eup %1059 }
 0x4a7   :  { %v293_v27 = vmul.f32 %v1060_v24, %v1048_v61  ;;  %v1062_v31 = vpop.eup %1061  ;;  %v546_v33 = vpop.xlane.xlu2 %545 }
 0x4a8   :  { %v677_v32 = vsel %vm218_vm9, %v1062_v31, 0.0 }
 0x4ac   :  { %v321_v26 = vpop.permute.xlu0 %320  ;;  %548 = vadd.xlane.f32.xlu2 %v547_v25 }
 0x4ad   :  { %341 = vmatpush.msra.mxu3 %v321_v26 }
 0x4ae   :  { %978 = vmatmul.msk.f32.vlgmr.msra.gmra.mxu3 %vm218_vm9, %v293_v27 }
 0x4af   :  { %v419_v34 = vpop.xlane.xlu2 %418 }
 0x4b0   :  { %1063 = vrcp.f32 %v419_v34 }
 0x4b4   :  { %v555_v36 = vpop.permute.xlu0 %554 }
 0x4b5   :  { %1025 = vrot.lane.b32.xlu1 %v1024_v28, %s1203_s30 }
 0x4b6   :  { %v1064_v40 = vpop.eup %1063 }
 0x4b7   :  { %v423_v44 = vmul.f32 %v1064_v40, %v1403_v5  ;;  %v770_v5 = vld [vmem:[%s1526_s5 + $0x10] sm:$0xff]  ;;  %v863_v40 = vld [vmem:[%s1530_s9] sm:$0xff] }
 0x4b8   :  { %795 = vmatpush.msra.mxu2 %v770_v5 }
 0x4ba   :  { %796 = vmatpush.msra.mxu2 %v769_v6 }
 0x4bc   :  { %v685_v38 = vpop.permute.xlu0 %684  ;;  %797 = vmatpush.msra.mxu2 %v768_v7 }
 0x4c4   :  { %580 = vrot.lane.b32.xlu2 %v1340_v57, %s1201_s28  ;;  %v711_v47 = vpop.permute.xlu0 %710 }
 0x4df   :  { %678 = vadd.xlane.f32.xlu1 %v677_v32 }
 0x50f   :  { %v416_v37 = vpop.xlane.xlu1 %415 }
 0x510   :  { %1065 = vrcp.f32 %v416_v37  ;;  %v866_v37 = vld [vmem:[%s1530_s9 + $0x18] sm:$0xff] }
 0x511   :  { %1067 = vrcp.f32 %v546_v33  ;;  %889 = vmatpush.msrb.mxu0 %v866_v37 }
 0x516   :  { %v1066_v41 = vpop.eup %1065 }
 0x517   :  { %v676_v35 = vpop.xlane.xlu2 %675  ;;  %v422_v45 = vmul.f32 %v1066_v41, %v1054_v14  ;;  %v1068_v48 = vpop.eup %1067 }
 0x518   :  { %v552_v50 = vmul.f32 %v1068_v48, %v1399_v3 }
 0x51f   :  { %v549_v55 = vpop.xlane.xlu2 %548 }
 0x520   :  { %1069 = vrcp.f32 %v549_v55  ;;  %v865_v55 = vld [vmem:[%s1530_s9 + $0x10] sm:$0xff] }
 0x521   :  { %1071 = vrcp.f32 %v676_v35  ;;  %890 = vmatpush.msrb.mxu0 %v865_v55  ;;  %v1036_v55 = vld [vmem:[#allocation7] ss:$0 sm:$0xff] }
 0x526   :  { %v1070_v49 = vpop.eup %1069 }
 0x527   :  { %v1026_v57 = vpop.permute.xlu1 %1025  ;;  %v581_v46 = vpop.permute.xlu2 %580  ;;  %v553_v51 = vmul.f32 %v1070_v49, %v1058_v23  ;;  %v1033_v49 = vld [vmem:[%s1528_s7] ss:$0 sm:$0xff] }
 0x528   :  { %v1028_v42 = vunpack.i.h.bf16 %v1026_v57  ;;  %v1027_v43 = vunpack.i.l.bf16 %v1026_v57  ;;  %v1072_v52 = vpop.eup %1071 }
 0x529   :  { %v682_v53 = vmul.f32 %v1072_v52, %v1056_v20  ;;  %v1034_v52 = vld [vmem:[%s1529_s8] ss:$0 sm:$0xff] }
 0x52a   :  { %445 = vmatpush.msrb.mxu3 %v1027_v43  ;;  %471 = vmatpush.msrb.mxu1 %v1028_v42 }
 0x52b   :  { %983 = vmatmul.msk.f32.vlgmr.msrb.gmra.mxu3 %vm218_vm9, %v422_v45  ;;  %984 = vmatmul.msk.f32.vlgmr.msrb.gmra.mxu1 %vm218_vm9, %v423_v44 }
 0x52c   :  { %575 = vmatpush.msra.mxu3 %v555_v36  ;;  %601 = vmatpush.msra.mxu1 %v581_v46 }
 0x52e   :  { %705 = vmatpush.msrb.mxu3 %v685_v38  ;;  %731 = vmatpush.msrb.mxu1 %v711_v47  ;;  %v864_v38 = vld [vmem:[%s1530_s9 + $0x8] sm:$0xff] }
 0x52f   :  { %891 = vmatpush.msrb.mxu0 %v864_v38 }
 0x531   :  { %v343_v59 = vpop.f32.mrf.mxu3  ;;  %892 = vmatpush.msrb.mxu0 %v863_v40 }
 0x533   :  { %989 = vmatmul.msk.f32.vlgmr.msra.gmra.mxu3 %vm218_vm9, %v552_v50  ;;  %990 = vmatmul.msk.f32.vlgmr.msra.gmra.mxu1 %vm218_vm9, %v553_v51 }
 0x53b   :  { %995 = vmatmul.msk.f32.vlgmr.msrb.gmra.mxu3 %vm218_vm9, %v682_v53 }
 0x552   :  { %v679_v54 = vpop.xlane.xlu1 %678 }
 0x553   :  { %1073 = vrcp.f32 %v679_v54 }
 0x559   :  { %v1074_v56 = vpop.eup %1073 }
 0x55a   :  { %v683_v58 = vmul.f32 %v1074_v56, %v1062_v31 }
 0x55c   :  { %996 = vmatmul.msk.f32.vlgmr.msrb.gmra.mxu1 %vm218_vm9, %v683_v58 }
 0x5a8   :  { %v473_v62 = vpop.f32.mrf.mxu1 }
 0x5ae   :  { %v447_v60 = vpop.f32.mrf.mxu3 }
 0x5af   :  { %738 = vrot.lane.b32.xlu0 %v447_v60, %s1188_s19 }
 0x5b0   :  { %v603_v2 = vpop.f32.mrf.mxu1 }
 0x5b6   :  { %v577_v61 = vpop.f32.mrf.mxu3 }
 0x5b7   :  { %746 = vrot.lane.b32.xlu0 %v577_v61, %s1204_s14 }
 0x5be   :  { %v707_v63 = vpop.f32.mrf.mxu3 }
 0x5bf   :  { %740 = vrot.lane.b32.xlu0 %v473_v62, %s1188_s19  ;;  %754 = vrot.lane.b32.xlu2 %v707_v63, %s1205_s15 }
 0x5c7   :  { %748 = vrot.lane.b32.xlu2 %v603_v2, %s1204_s14 }
 0x5d9   :  { %v733_v3 = vpop.f32.mrf.mxu1 }
 0x5da   :  { %756 = vrot.lane.b32.xlu0 %v733_v3, %s1205_s15 }
 0x619   :  { %v755_v12 = vpop.permute.xlu2 %754 }
 0x621   :  { %v739_v8 = vpop.permute.xlu0 %738  ;;  %v749_v17 = vpop.permute.xlu2 %748 }
 0x622   :  { %v760_v9 = vsel %vm218_vm9, %v1388_v39, %v739_v8  ;;  %v924_v8 = vld [vmem:[%s1532_s11 + $0x30] sm:$0xff] }
 0x629   :  { %v747_v11 = vpop.permute.xlu0 %746 }
 0x62a   :  { %v763_v13 = vsel %vm762_vm11, %v760_v9, %v747_v11  ;;  %v923_v9 = vld [vmem:[%s1532_s11 + $0x28] sm:$0xff]  ;;  %v922_v11 = vld [vmem:[%s1532_s11 + $0x20] sm:$0xff] }
 0x62b   :  { %v766_v14 = vsel %vm765_vm12, %v763_v13, %v755_v12  ;;  %v921_v12 = vld [vmem:[%s1532_s11 + $0x18] sm:$0xff]  ;;  %v920_v13 = vld [vmem:[%s1532_s11 + $0x10] sm:$0xff] }
 0x62c   :  { %997 = vmatmul.msk.f32.vlgmr.msra.gmra.mxu2 %vm105_vm0, %v766_v14  ;;  %v919_v14 = vld [vmem:[%s1532_s11 + $0x8] sm:$0xff] }
 0x631   :  { %v741_v15 = vpop.permute.xlu0 %740 }
 0x632   :  { %v761_v16 = vsel %vm218_vm9, %v343_v59, %v741_v15  ;;  %v918_v15 = vld [vmem:[%s1532_s11] sm:$0xff] }
 0x633   :  { %v764_v19 = vsel %vm762_vm11, %v761_v16, %v749_v17  ;;  %v1035_v16 = vld [vmem:[#allocation6] ss:$0 sm:$0xff] }
 0x64c   :  { %v757_v18 = vpop.permute.xlu0 %756 }
 0x64d   :  { %v767_v20 = vsel %vm765_vm12, %v764_v19, %v757_v18 }
 0x64e   :  { %998 = vmatmul.msk.f32.gmra.mxu2 %vm105_vm0, %v767_v20 }
 0x6af   :  { %v799_v22 = vpop.f32.mrf.mxu2 }
 0x6b0   :  { %v800_v23 = vadd.f32 %v1032_v21, %v799_v22 }
 0x6b2   :  { %v1450_v39 = vadd.f32 %v800_v23, %v1289_v0 }
 0x6b4   :  { %v809_v24 = vsel %vm105_vm0, %v1450_v39, 0.0 }
 0x6b5   :  { %810 = vadd.xlane.f32.xlu1 %v809_v24 }
 0x6d1   :  { %v802_v25 = vpop.f32.mrf.mxu2 }
 0x6d2   :  { %v803_v26 = vadd.f32 %v1032_v21, %v802_v25 }
 0x6d4   :  { %v1455_v27 = vadd.f32 %v803_v26, %v1291_v1 }
 0x6d6   :  { %v812_v28 = vsel %vm105_vm0, %v1455_v27, 0.0 }
 0x6d7   :  { %813 = vadd.xlane.f32.xlu2 %v812_v28 }
 0x728   :  { %v811_v29 = vpop.xlane.xlu1 %810 }
 0x729   :  { %v815_v30 = vmul.f32 %v811_v29, %v1297_v10 }
 0x72b   :  { %v817_v31 = vsub.f32 %v1450_v39, %v815_v30 }
 0x72d   :  { %v819_v0 = vmul.f32 %v817_v31, %v817_v31 }
 0x72f   :  { %v821_v32 = vsel %vm105_vm0, %v819_v0, 0.0 }
 0x730   :  { %822 = vadd.xlane.f32.xlu0 %v821_v32 }
 0x74a   :  { %v814_v33 = vpop.xlane.xlu2 %813 }
 0x74b   :  { %v816_v34 = vmul.f32 %v814_v33, %v1297_v10 }
 0x74d   :  { %v818_v35 = vsub.f32 %v1455_v27, %v816_v34 }
 0x74f   :  { %v820_v1 = vmul.f32 %v818_v35, %v818_v35 }
 0x751   :  { %v824_v36 = vsel %vm105_vm0, %v820_v1, 0.0 }
 0x752   :  { %825 = vadd.xlane.f32.xlu1 %v824_v36 }
 0x7a3   :  { %v823_v41 = vpop.xlane.xlu0 %822 }
 0x7a4   :  { %v827_v57 = vmul.f32 %v823_v41, %v1297_v10 }
 0x7a6   :  { %v829_v42 = vadd.f32 1e-05, %v827_v57 }
 0x7a8   :  { %1075 = vrsqrt.f32 %v829_v42  ;;  %vm837_vm14 = vweird.f32 %v829_v42 }
 0x7ae   :  { %v1076_v43 = vpop.eup %1075 }
 0x7af   :  { %v832_v44 = vmul.f32 %v1076_v43, %v829_v42  ;;  %vm838_vm13 = vweird.f32 %v1076_v43 }
 0x7b0   :  { %vm839_vm15 = vmor %vm837_vm14, %vm838_vm13 }
 0x7b1   :  { %v833_v45 = vmul.f32 %v1076_v43, %v832_v44 }
 0x7b3   :  { %v834_v46 = vmul.f32 0.5, %v833_v45 }
 0x7b5   :  { %v835_v47 = vsub.f32 1.5, %v834_v46 }
 0x7b7   :  { %v836_v48 = vmul.f32 %v1076_v43, %v835_v47 }
 0x7b9   :  { %v840_v50 = vsel %vm839_vm15, %v1076_v43, %v836_v48 }
 0x7ba   :  { %v851_v51 = vmul.f32 %v840_v50, %v817_v31 }
 0x7bc   :  { %v856_v53 = vmul.f32 %v1033_v49, %v851_v51 }
 0x7be   :  { %v861_v54 = vadd.f32 %v1034_v52, %v856_v53 }
 0x7c0   :  { %999 = vmatmul.msk.f32.vlgmr.msrb.gmra.mxu0 %vm105_vm0, %v861_v54 }
 0x7c5   :  { %v826_v56 = vpop.xlane.xlu1 %825 }
 0x7c6   :  { %v828_v58 = vmul.f32 %v826_v56, %v1297_v10  ;;  %v925_v10 = vld [vmem:[%s1532_s11 + $0x38] sm:$0xff] }
 0x7c7   :  { %945 = vmatpush.msra.mxu3 %v925_v10 }
 0x7c8   :  { %v830_v59 = vadd.f32 1e-05, %v828_v58 }
 0x7c9   :  { %946 = vmatpush.msra.mxu3 %v924_v8 }
 0x7ca   :  { %1077 = vrsqrt.f32 %v830_v59  ;;  %vm847_vm2 = vweird.f32 %v830_v59 }
 0x7cb   :  { %947 = vmatpush.msra.mxu3 %v923_v9 }
 0x7cd   :  { %948 = vmatpush.msra.mxu3 %v922_v11 }
 0x7cf   :  { %949 = vmatpush.msra.mxu3 %v921_v12 }
 0x7d0   :  { %v1078_v60 = vpop.eup %1077 }
 0x7d1   :  { %v842_v61 = vmul.f32 %v1078_v60, %v830_v59  ;;  %vm848_vm1 = vweird.f32 %v1078_v60  ;;  %950 = vmatpush.msra.mxu3 %v920_v13 }
 0x7d2   :  { %vm849_vm3 = vmor %vm847_vm2, %vm848_vm1 }
 0x7d3   :  { %v843_v62 = vmul.f32 %v1078_v60, %v842_v61  ;;  %951 = vmatpush.msra.mxu3 %v919_v14 }
 0x7d5   :  { %v844_v63 = vmul.f32 0.5, %v843_v62  ;;  %952 = vmatpush.msra.mxu3 %v918_v15 }
 0x7d7   :  { %v845_v2 = vsub.f32 1.5, %v844_v63 }
 0x7d9   :  { %v846_v3 = vmul.f32 %v1078_v60, %v845_v2 }
 0x7db   :  { %v850_v4 = vsel %vm849_vm3, %v1078_v60, %v846_v3 }
 0x7dc   :  { %v852_v5 = vmul.f32 %v850_v4, %v818_v35 }
 0x7de   :  { %v857_v6 = vmul.f32 %v1033_v49, %v852_v5 }
 0x7e0   :  { %v862_v7 = vadd.f32 %v1034_v52, %v857_v6 }
 0x7e2   :  { %1000 = vmatmul.msk.f32.gmra.mxu0 %vm105_vm0, %v862_v7 }
 0x83d   :  { %v894_v17 = vpop.f32.mrf.mxu0 }
 0x83e   :  { %v895_v18 = vadd.f32 %v1035_v16, %v894_v17 }
 0x840   :  { %v902_v19 = vmul.f32 0.044715, %v895_v18  ;;  %v900_v25 = vmul.f32 0.5, %v895_v18 }
 0x842   :  { %v904_v20 = vmul.f32 %v902_v19, %v895_v18 }
 0x844   :  { %v906_v21 = vmul.f32 %v904_v20, %v895_v18 }
 0x846   :  { %v908_v22 = vadd.f32 %v906_v21, %v895_v18 }
 0x848   :  { %v910_v23 = vmul.f32 0.7978846, %v908_v22 }
 0x84a   :  { %1079 = vtanh.f32 %v910_v23 }
 0x850   :  { %v1080_v24 = vpop.eup %1079 }
 0x851   :  { %v914_v26 = vadd.f32 1.0, %v1080_v24 }
 0x853   :  { %v916_v28 = vmul.f32 %v914_v26, %v900_v25 }
 0x855   :  { %1001 = vmatmul.msk.f32.vlgmr.msra.gmra.mxu3 %vm930_vm4, %v916_v28 }
 0x85f   :  { %v897_v29 = vpop.f32.mrf.mxu0 }
 0x860   :  { %v898_v30 = vadd.f32 %v1035_v16, %v897_v29 }
 0x862   :  { %v903_v31 = vmul.f32 0.044715, %v898_v30  ;;  %v901_v1 = vmul.f32 0.5, %v898_v30 }
 0x864   :  { %v905_v0 = vmul.f32 %v903_v31, %v898_v30 }
 0x866   :  { %v907_v32 = vmul.f32 %v905_v0, %v898_v30 }
 0x868   :  { %v909_v33 = vadd.f32 %v907_v32, %v898_v30 }
 0x86a   :  { %v911_v34 = vmul.f32 0.7978846, %v909_v33 }
 0x86c   :  { %1081 = vtanh.f32 %v911_v34 }
 0x872   :  { %v1082_v35 = vpop.eup %1081 }
 0x873   :  { %v915_v36 = vadd.f32 1.0, %v1082_v35 }
 0x875   :  { %v917_v37 = vmul.f32 %v915_v36, %v901_v1 }
 0x877   :  { %1002 = vmatmul.msk.f32.gmra.mxu3 %vm930_vm4, %v917_v37 }
 0x8d8   :  { %v954_v38 = vpop.f32.mrf.mxu3 }
 0x8d9   :  { %v955_v40 = vadd.f32 %v1036_v55, %v954_v38 }
 0x8db   :  { %v960_v41 = vadd.f32 %v955_v40, %v1450_v39 }
 0x8dd   :  { %962 = vst.msk [vmem:[%s1534_s13] sm:$0xff] %vm105_vm0, %v960_v41 }
 0x8fa   :  { %v957_v57 = vpop.f32.mrf.mxu3 }
 0x8fb   :  { %v958_v42 = vadd.f32 %v1036_v55, %v957_v57 }
 0x8fd   :  { %v961_v43 = vadd.f32 %v958_v42, %v1455_v27 }
 0x8ff   :  { %963 = vst.msk [vmem:[%s1534_s13 + $0x8] sm:$0xff] %vm105_vm0, %v961_v43 }
 0x900   :  { %968 = vsyncpa [#allocation3], 1 }
 0x901   :  { %969 = vsyncpa [#allocation5], 1 }
 0x902   :  { %970 = vsyncpa [#allocation8], 1 }

</bundles_post_ra>
